<compile_context>
chip_gen: v6e
topology: v6e:2x2x1
jax: 0.10.0
libtpu: 0.0.40
codegen_flags: <defaults>
</compile_context>

<pallas_src>
import functools

import jax
import jax.numpy as jnp
from jax.experimental import pallas as pl
from jax.experimental.pallas import tpu as pltpu


def ann_kernel(x_ref,
               w_i2h, b_i2h,
               w1, b1, w2, b2, w3, b3, w4, b4, w5, b5, w6, b6,
               w_h2o, b_h2o,
               out_ref):
    """One batch tile per grid step; params resident in VMEM across steps.

    x_ref   : [nx, TB]      (features x batch-tile, batch on lanes)
    w_*     : [out, in]     (PyTorch Linear layout)
    b_*     : [out, 1]      (broadcast along lanes)
    out_ref : [ny, TB]
    """
    h = x_ref[...].astype(jnp.float32)

    def dense_relu(h, w_ref, b_ref):
        z = jnp.dot(w_ref[...], h, preferred_element_type=jnp.float32) + b_ref[...]
        return jnp.maximum(z, 0.0)

    h = dense_relu(h, w_i2h, b_i2h)          # i2h  + relu   (dropout = identity)
    h = dense_relu(h, w1, b1)                # h2h1 + relu
    h = dense_relu(h, w2, b2)                # h2h2 + relu
    h = dense_relu(h, w3, b3)                # h2h3 + relu
    h = dense_relu(h, w4, b4)                # h2h4 + relu
    h = dense_relu(h, w5, b5)                # h2h5 + relu
    h = dense_relu(h, w6, b6)                # h2h6 + relu

    logits = jnp.dot(w_h2o[...], h, preferred_element_type=jnp.float32) + b_h2o[...]
    out_ref[...] = jax.nn.sigmoid(logits).astype(out_ref.dtype)


def make_params(key, nx, ny, hidden, dtype=jnp.float32):
    """Deterministic init. Shapes mirror torch.nn.Linear: W [out, in], b [out, 1]."""
    dims = [(nx, hidden)] + [(hidden, hidden)] * 6 + [(hidden, ny)]
    params = []
    for fan_in, fan_out in dims:
        kw, kb, key = jax.random.split(key, 3)
        bound = 1.0 / float(fan_in) ** 0.5
        w = jax.random.uniform(kw, (fan_out, fan_in), dtype, -bound, bound)
        b = jax.random.uniform(kb, (fan_out, 1), dtype, -bound, bound)
        params += [w, b]
    return params


@functools.partial(jax.jit, static_argnames=("ny",))
def ann_forward(x, params, *, ny):
    batch, nx = x.shape

    # Batch tile: multiple of 128 (lane width), capped at 512 rows.
    tb = min(512, pl.cdiv(batch, 128) * 128)
    b_pad = pl.cdiv(batch, tb) * tb

    # Wrapper-side pad + transpose so batch maps to the lane (last) axis.
    x_p = jnp.pad(x, ((0, b_pad - batch), (0, 0)))
    x_t = x_p.T                                        # [nx, b_pad]

    grid = (b_pad // tb,)

    # x / out tiles move with the grid step; weights & biases use a constant
    # index_map so they are fetched once and stay resident in VMEM.
    in_specs = [pl.BlockSpec((nx, tb), lambda i: (0, i))]
    in_specs += [pl.BlockSpec(p.shape, lambda i: (0, 0)) for p in params]
    out_spec = pl.BlockSpec((ny, tb), lambda i: (0, i))

    out_t = pl.pallas_call(
        ann_kernel,
        out_shape=jax.ShapeDtypeStruct((ny, b_pad), x.dtype),
        grid=grid,
        in_specs=in_specs,
        out_specs=out_spec,
        compiler_params=pltpu.CompilerParams(
            dimension_semantics=("parallel",),   # megacore on v7x; no-op v5e/v6e
            vmem_limit_bytes=32 * 1024 * 1024,   # safe on v7x's smaller VMEM
        ),
    )(x_t, *params)

    return out_t.T[:batch]                             # back to [batch, ny]


def ann_reference(x, params):
    """Plain-JAX reference (PyTorch-layout params) for correctness check."""
    h = x.astype(jnp.float32)
    ws = params[0::2]
    bs = params[1::2]
    for w, b in zip(ws[:-1], bs[:-1]):
        h = jnp.maximum(h @ w.T + b[:, 0], 0.0)
    return jax.nn.sigmoid(h @ ws[-1].T + bs[-1][:, 0]).astype(x.dtype)


if __name__ == "__main__":
    nx, ny, hidden = 16, 4, 32

    key = jax.random.PRNGKey(0)
    kx, kx2, kp = jax.random.split(key, 3)
    params = make_params(kp, nx, ny, hidden)

    # Small primary case (single tile, padded batch).
    x = jax.random.normal(kx, (8, nx), jnp.float32)
    out = jax.block_until_ready(ann_forward(x, params, ny=ny))
    ref = ann_reference(x, params)
    assert out.shape == (8, ny), out.shape
    assert jnp.allclose(out, ref, atol=1e-5, rtol=1e-5), \
        f"max abs err {jnp.max(jnp.abs(out - ref))}"

    # Multi-tile case exercising the grid loop + remainder padding.
    x2 = jax.random.normal(kx2, (600, nx), jnp.float32)
    out2 = jax.block_until_ready(ann_forward(x2, params, ny=ny))
    ref2 = ann_reference(x2, params)
    assert out2.shape == (600, ny), out2.shape
    assert jnp.allclose(out2, ref2, atol=1e-5, rtol=1e-5), \
        f"max abs err {jnp.max(jnp.abs(out2 - ref2))}"

    print("KERNEL_OK")
</pallas_src>

<mosaic_0001>
module attributes {stable_mosaic.version = 11 : i64} {
  func.func @ann_kernel(%arg0: i32, %arg1: memref<16x128xf32, #tpu.memory_space<vmem>>, %arg2: memref<32x16xf32, #tpu.memory_space<vmem>>, %arg3: memref<32x1xf32, #tpu.memory_space<vmem>>, %arg4: memref<32x32xf32, #tpu.memory_space<vmem>>, %arg5: memref<32x1xf32, #tpu.memory_space<vmem>>, %arg6: memref<32x32xf32, #tpu.memory_space<vmem>>, %arg7: memref<32x1xf32, #tpu.memory_space<vmem>>, %arg8: memref<32x32xf32, #tpu.memory_space<vmem>>, %arg9: memref<32x1xf32, #tpu.memory_space<vmem>>, %arg10: memref<32x32xf32, #tpu.memory_space<vmem>>, %arg11: memref<32x1xf32, #tpu.memory_space<vmem>>, %arg12: memref<32x32xf32, #tpu.memory_space<vmem>>, %arg13: memref<32x1xf32, #tpu.memory_space<vmem>>, %arg14: memref<32x32xf32, #tpu.memory_space<vmem>>, %arg15: memref<32x1xf32, #tpu.memory_space<vmem>>, %arg16: memref<4x32xf32, #tpu.memory_space<vmem>>, %arg17: memref<4x1xf32, #tpu.memory_space<vmem>>, %arg18: memref<4x128xf32, #tpu.memory_space<vmem>>) attributes {dimension_semantics = [#tpu.dimension_semantics<parallel>], iteration_bounds = array<i64: 1>, scalar_prefetch = 0 : i64, scratch_operands = 0 : i64, tpu.core_type = #tpu.core_type<tc>, window_params = [{transform_indices = @transform_0, window_bounds = array<i64: 16, 128>}, {pipeline_mode = #tpu.pipeline_mode<synchronous>, transform_indices = @transform_1, window_bounds = array<i64: 32, 16>}, {pipeline_mode = #tpu.pipeline_mode<synchronous>, transform_indices = @transform_2, window_bounds = array<i64: 32, 1>}, {pipeline_mode = #tpu.pipeline_mode<synchronous>, transform_indices = @transform_3, window_bounds = array<i64: 32, 32>}, {pipeline_mode = #tpu.pipeline_mode<synchronous>, transform_indices = @transform_4, window_bounds = array<i64: 32, 1>}, {pipeline_mode = #tpu.pipeline_mode<synchronous>, transform_indices = @transform_5, window_bounds = array<i64: 32, 32>}, {pipeline_mode = #tpu.pipeline_mode<synchronous>, transform_indices = @transform_6, window_bounds = array<i64: 32, 1>}, {pipeline_mode = #tpu.pipeline_mode<synchronous>, transform_indices = @transform_7, window_bounds = array<i64: 32, 32>}, {pipeline_mode = #tpu.pipeline_mode<synchronous>, transform_indices = @transform_8, window_bounds = array<i64: 32, 1>}, {pipeline_mode = #tpu.pipeline_mode<synchronous>, transform_indices = @transform_9, window_bounds = array<i64: 32, 32>}, {pipeline_mode = #tpu.pipeline_mode<synchronous>, transform_indices = @transform_10, window_bounds = array<i64: 32, 1>}, {pipeline_mode = #tpu.pipeline_mode<synchronous>, transform_indices = @transform_11, window_bounds = array<i64: 32, 32>}, {pipeline_mode = #tpu.pipeline_mode<synchronous>, transform_indices = @transform_12, window_bounds = array<i64: 32, 1>}, {pipeline_mode = #tpu.pipeline_mode<synchronous>, transform_indices = @transform_13, window_bounds = array<i64: 32, 32>}, {pipeline_mode = #tpu.pipeline_mode<synchronous>, transform_indices = @transform_14, window_bounds = array<i64: 32, 1>}, {pipeline_mode = #tpu.pipeline_mode<synchronous>, transform_indices = @transform_15, window_bounds = array<i64: 4, 32>}, {pipeline_mode = #tpu.pipeline_mode<synchronous>, transform_indices = @transform_16, window_bounds = array<i64: 4, 1>}, {transform_indices = @transform_17, window_bounds = array<i64: 4, 128>}]} {
    %c0 = arith.constant 0 : index
    %c0_0 = arith.constant 0 : index
    %0 = vector.load %arg1[%c0, %c0_0] : memref<16x128xf32, #tpu.memory_space<vmem>>, vector<16x128xf32>
    %c0_1 = arith.constant 0 : index
    %c0_2 = arith.constant 0 : index
    %1 = vector.load %arg2[%c0_1, %c0_2] : memref<32x16xf32, #tpu.memory_space<vmem>>, vector<32x16xf32>
    %cst = arith.constant dense<0.000000e+00> : vector<32x128xf32>
    %2 = tpu.matmul %1, %0, %cst {dimension_numbers = #tpu.dot_dimension_numbers<[1], [0], [0], [1], [0, 0, 1, 1], [], []>} : vector<32x16xf32>, vector<16x128xf32>, vector<32x128xf32> -> vector<32x128xf32>
    %c0_3 = arith.constant 0 : index
    %c0_4 = arith.constant 0 : index
    %3 = vector.load %arg3[%c0_3, %c0_4] : memref<32x1xf32, #tpu.memory_space<vmem>>, vector<32x1xf32>
    %4 = vector.broadcast %3 : vector<32x1xf32> to vector<32x128xf32>
    %5 = arith.addf %2, %4 : vector<32x128xf32>
    %cst_5 = arith.constant 0.000000e+00 : f32
    %6 = vector.broadcast %cst_5 : f32 to vector<32x128xf32>
    %7 = arith.maximumf %5, %6 : vector<32x128xf32>
    %c0_6 = arith.constant 0 : index
    %c0_7 = arith.constant 0 : index
    %8 = vector.load %arg4[%c0_6, %c0_7] : memref<32x32xf32, #tpu.memory_space<vmem>>, vector<32x32xf32>
    %cst_8 = arith.constant dense<0.000000e+00> : vector<32x128xf32>
    %9 = tpu.matmul %8, %7, %cst_8 {dimension_numbers = #tpu.dot_dimension_numbers<[1], [0], [0], [1], [0, 0, 1, 1], [], []>} : vector<32x32xf32>, vector<32x128xf32>, vector<32x128xf32> -> vector<32x128xf32>
    %c0_9 = arith.constant 0 : index
    %c0_10 = arith.constant 0 : index
    %10 = vector.load %arg5[%c0_9, %c0_10] : memref<32x1xf32, #tpu.memory_space<vmem>>, vector<32x1xf32>
    %11 = vector.broadcast %10 : vector<32x1xf32> to vector<32x128xf32>
    %12 = arith.addf %9, %11 : vector<32x128xf32>
    %cst_11 = arith.constant 0.000000e+00 : f32
    %13 = vector.broadcast %cst_11 : f32 to vector<32x128xf32>
    %14 = arith.maximumf %12, %13 : vector<32x128xf32>
    %c0_12 = arith.constant 0 : index
    %c0_13 = arith.constant 0 : index
    %15 = vector.load %arg6[%c0_12, %c0_13] : memref<32x32xf32, #tpu.memory_space<vmem>>, vector<32x32xf32>
    %cst_14 = arith.constant dense<0.000000e+00> : vector<32x128xf32>
    %16 = tpu.matmul %15, %14, %cst_14 {dimension_numbers = #tpu.dot_dimension_numbers<[1], [0], [0], [1], [0, 0, 1, 1], [], []>} : vector<32x32xf32>, vector<32x128xf32>, vector<32x128xf32> -> vector<32x128xf32>
    %c0_15 = arith.constant 0 : index
    %c0_16 = arith.constant 0 : index
    %17 = vector.load %arg7[%c0_15, %c0_16] : memref<32x1xf32, #tpu.memory_space<vmem>>, vector<32x1xf32>
    %18 = vector.broadcast %17 : vector<32x1xf32> to vector<32x128xf32>
    %19 = arith.addf %16, %18 : vector<32x128xf32>
    %cst_17 = arith.constant 0.000000e+00 : f32
    %20 = vector.broadcast %cst_17 : f32 to vector<32x128xf32>
    %21 = arith.maximumf %19, %20 : vector<32x128xf32>
    %c0_18 = arith.constant 0 : index
    %c0_19 = arith.constant 0 : index
    %22 = vector.load %arg8[%c0_18, %c0_19] : memref<32x32xf32, #tpu.memory_space<vmem>>, vector<32x32xf32>
    %cst_20 = arith.constant dense<0.000000e+00> : vector<32x128xf32>
    %23 = tpu.matmul %22, %21, %cst_20 {dimension_numbers = #tpu.dot_dimension_numbers<[1], [0], [0], [1], [0, 0, 1, 1], [], []>} : vector<32x32xf32>, vector<32x128xf32>, vector<32x128xf32> -> vector<32x128xf32>
    %c0_21 = arith.constant 0 : index
    %c0_22 = arith.constant 0 : index
    %24 = vector.load %arg9[%c0_21, %c0_22] : memref<32x1xf32, #tpu.memory_space<vmem>>, vector<32x1xf32>
    %25 = vector.broadcast %24 : vector<32x1xf32> to vector<32x128xf32>
    %26 = arith.addf %23, %25 : vector<32x128xf32>
    %cst_23 = arith.constant 0.000000e+00 : f32
    %27 = vector.broadcast %cst_23 : f32 to vector<32x128xf32>
    %28 = arith.maximumf %26, %27 : vector<32x128xf32>
    %c0_24 = arith.constant 0 : index
    %c0_25 = arith.constant 0 : index
    %29 = vector.load %arg10[%c0_24, %c0_25] : memref<32x32xf32, #tpu.memory_space<vmem>>, vector<32x32xf32>
    %cst_26 = arith.constant dense<0.000000e+00> : vector<32x128xf32>
    %30 = tpu.matmul %29, %28, %cst_26 {dimension_numbers = #tpu.dot_dimension_numbers<[1], [0], [0], [1], [0, 0, 1, 1], [], []>} : vector<32x32xf32>, vector<32x128xf32>, vector<32x128xf32> -> vector<32x128xf32>
    %c0_27 = arith.constant 0 : index
    %c0_28 = arith.constant 0 : index
    %31 = vector.load %arg11[%c0_27, %c0_28] : memref<32x1xf32, #tpu.memory_space<vmem>>, vector<32x1xf32>
    %32 = vector.broadcast %31 : vector<32x1xf32> to vector<32x128xf32>
    %33 = arith.addf %30, %32 : vector<32x128xf32>
    %cst_29 = arith.constant 0.000000e+00 : f32
    %34 = vector.broadcast %cst_29 : f32 to vector<32x128xf32>
    %35 = arith.maximumf %33, %34 : vector<32x128xf32>
    %c0_30 = arith.constant 0 : index
    %c0_31 = arith.constant 0 : index
    %36 = vector.load %arg12[%c0_30, %c0_31] : memref<32x32xf32, #tpu.memory_space<vmem>>, vector<32x32xf32>
    %cst_32 = arith.constant dense<0.000000e+00> : vector<32x128xf32>
    %37 = tpu.matmul %36, %35, %cst_32 {dimension_numbers = #tpu.dot_dimension_numbers<[1], [0], [0], [1], [0, 0, 1, 1], [], []>} : vector<32x32xf32>, vector<32x128xf32>, vector<32x128xf32> -> vector<32x128xf32>
    %c0_33 = arith.constant 0 : index
    %c0_34 = arith.constant 0 : index
    %38 = vector.load %arg13[%c0_33, %c0_34] : memref<32x1xf32, #tpu.memory_space<vmem>>, vector<32x1xf32>
    %39 = vector.broadcast %38 : vector<32x1xf32> to vector<32x128xf32>
    %40 = arith.addf %37, %39 : vector<32x128xf32>
    %cst_35 = arith.constant 0.000000e+00 : f32
    %41 = vector.broadcast %cst_35 : f32 to vector<32x128xf32>
    %42 = arith.maximumf %40, %41 : vector<32x128xf32>
    %c0_36 = arith.constant 0 : index
    %c0_37 = arith.constant 0 : index
    %43 = vector.load %arg14[%c0_36, %c0_37] : memref<32x32xf32, #tpu.memory_space<vmem>>, vector<32x32xf32>
    %cst_38 = arith.constant dense<0.000000e+00> : vector<32x128xf32>
    %44 = tpu.matmul %43, %42, %cst_38 {dimension_numbers = #tpu.dot_dimension_numbers<[1], [0], [0], [1], [0, 0, 1, 1], [], []>} : vector<32x32xf32>, vector<32x128xf32>, vector<32x128xf32> -> vector<32x128xf32>
    %c0_39 = arith.constant 0 : index
    %c0_40 = arith.constant 0 : index
    %45 = vector.load %arg15[%c0_39, %c0_40] : memref<32x1xf32, #tpu.memory_space<vmem>>, vector<32x1xf32>
    %46 = vector.broadcast %45 : vector<32x1xf32> to vector<32x128xf32>
    %47 = arith.addf %44, %46 : vector<32x128xf32>
    %cst_41 = arith.constant 0.000000e+00 : f32
    %48 = vector.broadcast %cst_41 : f32 to vector<32x128xf32>
    %49 = arith.maximumf %47, %48 : vector<32x128xf32>
    %c0_42 = arith.constant 0 : index
    %c0_43 = arith.constant 0 : index
    %50 = vector.load %arg16[%c0_42, %c0_43] : memref<4x32xf32, #tpu.memory_space<vmem>>, vector<4x32xf32>
    %cst_44 = arith.constant dense<0.000000e+00> : vector<4x128xf32>
    %51 = tpu.matmul %50, %49, %cst_44 {dimension_numbers = #tpu.dot_dimension_numbers<[1], [0], [0], [1], [0, 0, 1, 1], [], []>} : vector<4x32xf32>, vector<32x128xf32>, vector<4x128xf32> -> vector<4x128xf32>
    %c0_45 = arith.constant 0 : index
    %c0_46 = arith.constant 0 : index
    %52 = vector.load %arg17[%c0_45, %c0_46] : memref<4x1xf32, #tpu.memory_space<vmem>>, vector<4x1xf32>
    %53 = vector.broadcast %52 : vector<4x1xf32> to vector<4x128xf32>
    %54 = arith.addf %51, %53 : vector<4x128xf32>
    %55 = arith.negf %54 : vector<4x128xf32>
    %56 = math.exp %55 : vector<4x128xf32>
    %cst_47 = arith.constant 1.000000e+00 : f32
    %57 = vector.broadcast %cst_47 : f32 to vector<4x128xf32>
    %58 = arith.addf %57, %56 : vector<4x128xf32>
    %59 = arith.divf %57, %58 : vector<4x128xf32>
    %c0_48 = arith.constant 0 : index
    %c0_49 = arith.constant 0 : index
    %60 = vector.load %arg18[%c0_48, %c0_49] : memref<4x128xf32, #tpu.memory_space<vmem>>, vector<4x128xf32>
    tpu.vector_store %arg18[%c0_48, %c0_49], %59 {strides = array<i32>} : memref<4x128xf32, #tpu.memory_space<vmem>>, vector<4x128xf32>,
    return
  }
  func.func @transform_0(%arg0: i32) -> (i32, i32) {
    %c0_i32 = arith.constant 0 : i32
    %c0_i32_0 = arith.constant 0 : i32
    return %c0_i32, %arg0 : i32, i32
  }
  func.func @transform_1(%arg0: i32) -> (i32, i32) {
    %c0_i32 = arith.constant 0 : i32
    %c0_i32_0 = arith.constant 0 : i32
    %c0_i32_1 = arith.constant 0 : i32
    return %c0_i32, %c0_i32_0 : i32, i32
  }
  func.func @transform_2(%arg0: i32) -> (i32, i32) {
    %c0_i32 = arith.constant 0 : i32
    %c0_i32_0 = arith.constant 0 : i32
    %c0_i32_1 = arith.constant 0 : i32
    return %c0_i32, %c0_i32_0 : i32, i32
  }
  func.func @transform_3(%arg0: i32) -> (i32, i32) {
    %c0_i32 = arith.constant 0 : i32
    %c0_i32_0 = arith.constant 0 : i32
    %c0_i32_1 = arith.constant 0 : i32
    return %c0_i32, %c0_i32_0 : i32, i32
  }
  func.func @transform_4(%arg0: i32) -> (i32, i32) {
    %c0_i32 = arith.constant 0 : i32
    %c0_i32_0 = arith.constant 0 : i32
    %c0_i32_1 = arith.constant 0 : i32
    return %c0_i32, %c0_i32_0 : i32, i32
  }
  func.func @transform_5(%arg0: i32) -> (i32, i32) {
    %c0_i32 = arith.constant 0 : i32
    %c0_i32_0 = arith.constant 0 : i32
    %c0_i32_1 = arith.constant 0 : i32
    return %c0_i32, %c0_i32_0 : i32, i32
  }
  func.func @transform_6(%arg0: i32) -> (i32, i32) {
    %c0_i32 = arith.constant 0 : i32
    %c0_i32_0 = arith.constant 0 : i32
    %c0_i32_1 = arith.constant 0 : i32
    return %c0_i32, %c0_i32_0 : i32, i32
  }
  func.func @transform_7(%arg0: i32) -> (i32, i32) {
    %c0_i32 = arith.constant 0 : i32
    %c0_i32_0 = arith.constant 0 : i32
    %c0_i32_1 = arith.constant 0 : i32
    return %c0_i32, %c0_i32_0 : i32, i32
  }
  func.func @transform_8(%arg0: i32) -> (i32, i32) {
    %c0_i32 = arith.constant 0 : i32
    %c0_i32_0 = arith.constant 0 : i32
    %c0_i32_1 = arith.constant 0 : i32
    return %c0_i32, %c0_i32_0 : i32, i32
  }
  func.func @transform_9(%arg0: i32) -> (i32, i32) {
    %c0_i32 = arith.constant 0 : i32
    %c0_i32_0 = arith.constant 0 : i32
    %c0_i32_1 = arith.constant 0 : i32
    return %c0_i32, %c0_i32_0 : i32, i32
  }
  func.func @transform_10(%arg0: i32) -> (i32, i32) {
    %c0_i32 = arith.constant 0 : i32
    %c0_i32_0 = arith.constant 0 : i32
    %c0_i32_1 = arith.constant 0 : i32
    return %c0_i32, %c0_i32_0 : i32, i32
  }
  func.func @transform_11(%arg0: i32) -> (i32, i32) {
    %c0_i32 = arith.constant 0 : i32
    %c0_i32_0 = arith.constant 0 : i32
    %c0_i32_1 = arith.constant 0 : i32
    return %c0_i32, %c0_i32_0 : i32, i32
  }
  func.func @transform_12(%arg0: i32) -> (i32, i32) {
    %c0_i32 = arith.constant 0 : i32
    %c0_i32_0 = arith.constant 0 : i32
    %c0_i32_1 = arith.constant 0 : i32
    return %c0_i32, %c0_i32_0 : i32, i32
  }
  func.func @transform_13(%arg0: i32) -> (i32, i32) {
    %c0_i32 = arith.constant 0 : i32
    %c0_i32_0 = arith.constant 0 : i32
    %c0_i32_1 = arith.constant 0 : i32
    return %c0_i32, %c0_i32_0 : i32, i32
  }
  func.func @transform_14(%arg0: i32) -> (i32, i32) {
    %c0_i32 = arith.constant 0 : i32
    %c0_i32_0 = arith.constant 0 : i32
    %c0_i32_1 = arith.constant 0 : i32
    return %c0_i32, %c0_i32_0 : i32, i32
  }
  func.func @transform_15(%arg0: i32) -> (i32, i32) {
    %c0_i32 = arith.constant 0 : i32
    %c0_i32_0 = arith.constant 0 : i32
    %c0_i32_1 = arith.constant 0 : i32
    return %c0_i32, %c0_i32_0 : i32, i32
  }
  func.func @transform_16(%arg0: i32) -> (i32, i32) {
    %c0_i32 = arith.constant 0 : i32
    %c0_i32_0 = arith.constant 0 : i32
    %c0_i32_1 = arith.constant 0 : i32
    return %c0_i32, %c0_i32_0 : i32, i32
  }
  func.func @transform_17(%arg0: i32) -> (i32, i32) {
    %c0_i32 = arith.constant 0 : i32
    %c0_i32_0 = arith.constant 0 : i32
    return %c0_i32, %arg0 : i32, i32
  }
}

</mosaic_0001>

<bundles_post_ra>
// kernel: ann_forward.1
= control target key start
LH: loop header
LB: loop body
LE: loop exit
PB: predicated region body
PF: predicated region fallthrough
CT: control target
= control target key end

     0   :  { %s1597_s0 = inlined_call_operand.vmem [shape: f32[16,128], index: 0, kind: input, shape index: {}]   ;;  %s1598_s1 = inlined_call_operand.vmem [shape: f32[32,16], index: 1, kind: input, shape index: {}]   ;;  %s1599_s2 = inlined_call_operand.vmem [shape: f32[32,1], index: 2, kind: input, shape index: {}]   ;;  %s1600_s3 = inlined_call_operand.vmem [shape: f32[32,32], index: 3, kind: input, shape index: {}]   ;;  %s1601_s4 = inlined_call_operand.vmem [shape: f32[32,1], index: 4, kind: input, shape index: {}]   ;;  %s1602_s5 = inlined_call_operand.vmem [shape: f32[32,32], index: 5, kind: input, shape index: {}]   ;;  %s1603_s6 = inlined_call_operand.vmem [shape: f32[32,1], index: 6, kind: input, shape index: {}]   ;;  %s1604_s7 = inlined_call_operand.vmem [shape: f32[32,32], index: 7, kind: input, shape index: {}]   ;;  %s1605_s8 = inlined_call_operand.vmem [shape: f32[32,1], index: 8, kind: input, shape index: {}]   ;;  %s1606_s9 = inlined_call_operand.vmem [shape: f32[32,32], index: 9, kind: input, shape index: {}]   ;;  %s1607_s10 = inlined_call_operand.vmem [shape: f32[32,1], index: 10, kind: input, shape index: {}]   ;;  %s1608_s11 = inlined_call_operand.vmem [shape: f32[32,32], index: 11, kind: input, shape index: {}]   ;;  %s1609_s12 = inlined_call_operand.vmem [shape: f32[32,1], index: 12, kind: input, shape index: {}]   ;;  %s1610_s13 = inlined_call_operand.vmem [shape: f32[32,32], index: 13, kind: input, shape index: {}]   ;;  %s1611_s14 = inlined_call_operand.vmem [shape: f32[32,1], index: 14, kind: input, shape index: {}]   ;;  %s1612_s15 = inlined_call_operand.vmem [shape: f32[4,32], index: 15, kind: input, shape index: {}]   ;;  %s1613_s16 = inlined_call_operand.vmem [shape: f32[4,1], index: 16, kind: input, shape index: {}]   ;;  %s1614_s17 = inlined_call_operand.hbm [shape: f32[4,128], index: 17, kind: output, shape index: {}]  }
   0x1   :  { %1617 = sst [smem:[#allocation5_spill]] %s1597_s0 }
   0x2   :  { %1618 = sst [smem:[#allocation6_spill]] %s1598_s1 }
   0x3   :  { %s1619_s26 = sld [smem:[#allocation5_spill]]  ;;  %vm87_vm0 = vcmask 130048   ;;  %v1291_v4 = vmov 0   ;;  %v66_v5 = vld [vmem:[%s1599_s2 + $0x18] sm:$0xff]  ;;  %v64_v7 = vld [vmem:[%s1599_s2 + $0x8] sm:$0xff]  ;;  %v65_v8 = vld [vmem:[%s1599_s2 + $0x10] sm:$0xff] }
   0x4   :  { %s1620_s30 = sld [smem:[#allocation6_spill]]  ;;  %1263 = vset.pattern.permute.xlu0 %v1291_v4  ;;  %1264 = vset.pattern.permute.xlu1 %v1291_v4  ;;  %v63_v10 = vld [vmem:[%s1599_s2] sm:$0xff]  ;;  %v196_v11 = vld [vmem:[%s1601_s4 + $0x18] sm:$0xff]  ;;  %v195_v12 = vld [vmem:[%s1601_s4 + $0x10] sm:$0xff] }
   0x5   :  { %84 = vperm.xlu0 %1263, %v66_v5   ;;  %74 = vperm.xlu1 %1264, %v64_v7  }
   0x9   :  { %v58_v0 = vld [vmem:[%s1619_s26 + $0x8] sm:$0xff]  ;;  %v57_v1 = vld [vmem:[%s1619_s26] sm:$0xff]  ;;  %79 = vperm.xlu0 %1263, %v65_v8   ;;  %69 = vperm.xlu1 %1264, %v63_v10  }
   0xa   :  { %v59_v2 = vld [vmem:[%s1620_s30] sm:$0xff]  ;;  %1154 = vmatprep.subr.mxu0 %v58_v0  ;;  %v60_v3 = vld [vmem:[%s1620_s30 + $0x8] sm:$0xff]  ;;  %v61_v6 = vld [vmem:[%s1620_s30 + $0x10] sm:$0xff] }
   0xb   :  { %1158 = vmatprep.mubr.msk.f32.mxu0 %vm87_vm0, %v59_v2  ;;  %1155 = vmatpush3.msra.mxu0 %v58_v0  ;;  %v62_v9 = vld [vmem:[%s1620_s30 + $0x18] sm:$0xff] }
   0xc   :  { %1156 = vmatprep.subr.mxu0 %v57_v1 }
   0xd   :  { %1157 = vmatpush3.msra.mxu0 %v57_v1  ;;  %214 = vperm.xlu0 %1263, %v196_v11  }
   0xe   :  { %1159 = vmatmul.mubr.msk.f32.vlgmr.msra.gmra.mxu0 %vm87_vm0, %v60_v3 }
   0xf   :  { %1161 = vmatprep.mubr.msk.f32.mxu0 %vm87_vm0, %v61_v6 }
  0x12   :  { %1162 = vmatmul.mubr.msk.f32.gmra.mxu0 %vm87_vm0, %v62_v9 }
  0x13   :  { %22 = vsyncpa [#allocation3], 0  ;;  %v194_v13 = vld [vmem:[%s1601_s4 + $0x8] sm:$0xff]  ;;  %209 = vperm.xlu1 %1264, %v195_v12   ;;  %v193_v14 = vld [vmem:[%s1601_s4] sm:$0xff]  ;;  %vm217_vm1 = vcmask 261120   ;;  %vm1293_vm2 = vmmov 0  }
  0x14   :  { %204 = vperm.xlu0 %1263, %v194_v13   ;;  %v326_v15 = vld [vmem:[%s1603_s6 + $0x18] sm:$0xff]  ;;  %v325_v16 = vld [vmem:[%s1603_s6 + $0x10] sm:$0xff]  ;;  %v324_v17 = vld [vmem:[%s1603_s6 + $0x8] sm:$0xff]  ;;  %s1294_s23 = smov [#allocation2]  }
  0x15   :  { %v323_v18 = vld [vmem:[%s1603_s6] sm:$0xff]  ;;  %v455_v19 = vld [vmem:[%s1605_s8 + $0x18] sm:$0xff]  ;;  %v454_v20 = vld [vmem:[%s1605_s8 + $0x10] sm:$0xff]  ;;  %s1057_s24 = sshll.u32 %s1294_s23, 4  ;;  %s1058_s24 = int_to_ptr.vmem [resolvable:$true] %s1057_s24 }
  0x16   :  { %v453_v21 = vld [vmem:[%s1605_s8 + $0x8] sm:$0xff]  ;;  %v452_v22 = vld [vmem:[%s1605_s8] sm:$0xff]  ;;  %v584_v23 = vld [vmem:[%s1607_s10 + $0x18] sm:$0xff]  ;;  %p1274_p1 = scmp.lt.s32.totalorder %s1058_s24, %s1058_s24 }
  0x17   :  { %199 = vperm.xlu1 %1264, %v193_v14   ;;  %v583_v24 = vld [vmem:[%s1607_s10 + $0x10] sm:$0xff]  ;;  %v582_v25 = vld [vmem:[%s1607_s10 + $0x8] sm:$0xff]  ;;  %v581_v26 = vld [vmem:[%s1607_s10] sm:$0xff] }
  0x18   :  { %344 = vperm.xlu0 %1263, %v326_v15   ;;  %v713_v27 = vld [vmem:[%s1609_s12 + $0x18] sm:$0xff]  ;;  %v712_v28 = vld [vmem:[%s1609_s12 + $0x10] sm:$0xff]  ;;  %v711_v29 = vld [vmem:[%s1609_s12 + $0x8] sm:$0xff] }
  0x19   :  { %v710_v30 = vld [vmem:[%s1609_s12] sm:$0xff]  ;;  %v842_v31 = vld [vmem:[%s1611_s14 + $0x18] sm:$0xff]  ;;  %v841_v32 = vld [vmem:[%s1611_s14 + $0x10] sm:$0xff]  ;;  %s1269_s12 = scalar_lea.vmem %s1058_s24, 64 }
  0x1a   :  { %v840_v33 = vld [vmem:[%s1611_s14 + $0x8] sm:$0xff]  ;;  %v839_v34 = vld [vmem:[%s1611_s14] sm:$0xff]  ;;  %v191_v54 = vld [vmem:[%s1600_s3 + $0x10] sm:$0xff]  ;;  %p1270_p0 = scmp.ne.s32.totalorder %s1058_s24, %s1269_s12  ;;  %p1275_p2 = scmp.lt.s32.totalorder %s1269_s12, %s1269_s12 }
  0x1b   :  { %339 = vperm.xlu1 %1264, %v325_v16   ;;  %v965_v35 = vld [vmem:[%s1613_s16] sm:$0xf]  ;;  %v190_v53 = vld [vmem:[%s1600_s3 + $0x8] sm:$0xff]  ;;  %v192_v55 = vld [vmem:[%s1600_s3 + $0x18] sm:$0xff] }
  0x1c   :  { %334 = vperm.xlu0 %1263, %v324_v17   ;;  %v189_v36 = vld [vmem:[%s1600_s3] sm:$0xff]  ;;  %v320_v9 = vld [vmem:[%s1602_s5 + $0x8] sm:$0xff]  ;;  %v321_v10 = vld [vmem:[%s1602_s5 + $0x10] sm:$0xff]  ;;  %p1276_p3 = por %p1275_p2, %p1274_p1 }
  0x1d   :  { %1172 = vmatprep.mubr.msk.f32.mxu1 %vm217_vm1, %v189_v36  ;;  %v319_v56 = vld [vmem:[%s1602_s5] sm:$0xff]  ;;  %v322_v11 = vld [vmem:[%s1602_s5 + $0x18] sm:$0xff] }
  0x1e   :  { %1186 = vmatprep.mubr.msk.f32.mxu0 %vm217_vm1, %v319_v56  ;;  %v448_v12 = vld [vmem:[%s1604_s7] sm:$0xff]  ;;  %p1277_p4 = pnand %p1276_p3, %p1270_p0 }
  0x1f   :  { %329 = vperm.xlu1 %1264, %v323_v18  }
  0x20   :  { %473 = vperm.xlu0 %1263, %v455_v19  }
  0x23   :  { %468 = vperm.xlu1 %1264, %v454_v20  }
  0x24   :  { %463 = vperm.xlu0 %1263, %v453_v21  }
  0x27   :  { %458 = vperm.xlu1 %1264, %v452_v22  }
  0x28   :  { %602 = vperm.xlu0 %1263, %v584_v23  }
  0x2b   :  { %597 = vperm.xlu1 %1264, %v583_v24  }
  0x2c   :  { %592 = vperm.xlu0 %1263, %v582_v25  }
  0x2f   :  { %587 = vperm.xlu1 %1264, %v581_v26  }
  0x30   :  { %731 = vperm.xlu0 %1263, %v713_v27  }
  0x33   :  { %726 = vperm.xlu1 %1264, %v712_v28  }
  0x34   :  { %721 = vperm.xlu0 %1263, %v711_v29   ;;  %v449_v29 = vld [vmem:[%s1604_s7 + $0x8] sm:$0xff] }
  0x37   :  { %716 = vperm.xlu1 %1264, %v710_v30   ;;  %v450_v30 = vld [vmem:[%s1604_s7 + $0x10] sm:$0xff] }
  0x38   :  { %860 = vperm.xlu0 %1263, %v842_v31   ;;  %v451_v31 = vld [vmem:[%s1604_s7 + $0x18] sm:$0xff] }
  0x3b   :  { %855 = vperm.xlu1 %1264, %v841_v32   ;;  %v577_v32 = vld [vmem:[%s1606_s9] sm:$0xff] }
  0x3c   :  { %850 = vperm.xlu0 %1263, %v840_v33  }
  0x3f   :  { %845 = vperm.xlu1 %1264, %v839_v34  }
  0x40   :  { %968 = vperm.xlu0 %1263, %v965_v35  }
  0x80   :  { %v85_v37 = vpop.permute.xlu0 %84  ;;  %v75_v39 = vpop.permute.xlu1 %74 }
  0x84   :  { %v80_v43 = vpop.permute.xlu0 %79  ;;  %v70_v48 = vpop.permute.xlu1 %69 }
  0x88   :  { %v215_v57 = vpop.permute.xlu0 %214 }
  0x8e   :  { %v210_v59 = vpop.permute.xlu1 %209 }
  0x8f   :  { %v205_v63 = vpop.permute.xlu0 %204 }
  0x92   :  { %v200_v4 = vpop.permute.xlu1 %199 }
  0x93   :  { %v345_v13 = vpop.permute.xlu0 %344 }
  0x96   :  { %v340_v15 = vpop.permute.xlu1 %339 }
  0x97   :  { %v335_v19 = vpop.permute.xlu0 %334 }
  0x9a   :  { %v330_v24 = vpop.permute.xlu1 %329 }
  0x9b   :  { %v474_v33 = vpop.permute.xlu0 %473 }
  0x9e   :  { %v469_v35 = vpop.permute.xlu1 %468 }
  0xce   :  { %v1160_v38 = vpop.f32.mrf.mxu0 }
  0xcf   :  { %v172_v45 = vadd.f32 %v1160_v38, %v75_v39  ;;  %v464_v39 = vpop.permute.xlu0 %463 }
  0xd0   :  { %v166_v40 = vpop.f32.mrf.mxu0 }
  0xd1   :  { %v167_v49 = vadd.f32 %v166_v40, %v70_v48  ;;  %v186_v51 = vmax.f32 %v172_v45, 0.0 }
  0xd2   :  { %v1163_v41 = vpop.f32.mrf.mxu0 }
  0xd3   :  { %v182_v42 = vadd.f32 %v1163_v41, %v85_v37  ;;  %v185_v52 = vmax.f32 %v167_v49, 0.0  ;;  %v578_v49 = vld [vmem:[%s1606_s9 + $0x8] sm:$0xff] }
  0xd4   :  { %v176_v44 = vpop.f32.mrf.mxu0 }
  0xd5   :  { %v188_v46 = vmax.f32 %v182_v42, 0.0  ;;  %v177_v47 = vadd.f32 %v176_v44, %v80_v43  ;;  %v459_v44 = vpop.permute.xlu1 %458 }
  0xd7   :  { %v187_v50 = vmax.f32 %v177_v47, 0.0  ;;  %1164 = vmatprep.subr.mxu1 %v188_v46 }
  0xd8   :  { %1165 = vmatpush3.msra.mxu1 %v188_v46 }
  0xd9   :  { %1166 = vmatprep.subr.mxu1 %v187_v50 }
  0xda   :  { %1167 = vmatpush3.msra.mxu1 %v187_v50  ;;  %v579_v50 = vld [vmem:[%s1606_s9 + $0x10] sm:$0xff] }
  0xdb   :  { %1168 = vmatprep.subr.mxu1 %v186_v51 }
  0xdc   :  { %1169 = vmatpush3.msra.mxu1 %v186_v51  ;;  %v580_v51 = vld [vmem:[%s1606_s9 + $0x18] sm:$0xff] }
  0xdd   :  { %1170 = vmatprep.subr.mxu1 %v185_v52 }
  0xde   :  { %1171 = vmatpush3.msra.mxu1 %v185_v52  ;;  %v706_v52 = vld [vmem:[%s1608_s11] sm:$0xff] }
  0xdf   :  { %1173 = vmatmul.mubr.msk.f32.vlgmr.msra.gmra.mxu1 %vm217_vm1, %v190_v53  ;;  %v603_v53 = vpop.permute.xlu0 %602 }
  0xe0   :  { %1175 = vmatprep.mubr.msk.f32.mxu1 %vm217_vm1, %v191_v54 }
  0xe3   :  { %1176 = vmatmul.mubr.msk.f32.gmra.mxu1 %vm217_vm1, %v192_v55  ;;  %v598_v55 = vpop.permute.xlu1 %597 }
  0xe4   :  { %1200 = vmatprep.mubr.msk.f32.mxu1 %vm217_vm1, %v448_v12 }
 0x19f   :  { %v1174_v58 = vpop.f32.mrf.mxu1 }
 0x1a0   :  { %v302_v1 = vadd.f32 %v1174_v58, %v205_v63 }
 0x1a1   :  { %v296_v60 = vpop.f32.mrf.mxu1 }
 0x1a2   :  { %v297_v5 = vadd.f32 %v296_v60, %v200_v4  ;;  %v316_v7 = vmax.f32 %v302_v1, 0.0 }
 0x1a3   :  { %v1177_v61 = vpop.f32.mrf.mxu1 }
 0x1a4   :  { %v312_v62 = vadd.f32 %v1177_v61, %v215_v57  ;;  %v315_v8 = vmax.f32 %v297_v5, 0.0  ;;  %v707_v5 = vld [vmem:[%s1608_s11 + $0x8] sm:$0xff] }
 0x1a5   :  { %v306_v0 = vpop.f32.mrf.mxu1 }
 0x1a6   :  { %v318_v2 = vmax.f32 %v312_v62, 0.0  ;;  %v307_v3 = vadd.f32 %v306_v0, %v210_v59  ;;  %v593_v59 = vpop.permute.xlu0 %592  ;;  %v588_v0 = vpop.permute.xlu1 %587 }
 0x1a8   :  { %v317_v6 = vmax.f32 %v307_v3, 0.0  ;;  %1178 = vmatprep.subr.mxu0 %v318_v2 }
 0x1a9   :  { %1179 = vmatpush3.msra.mxu0 %v318_v2 }
 0x1aa   :  { %1180 = vmatprep.subr.mxu0 %v317_v6 }
 0x1ab   :  { %1181 = vmatpush3.msra.mxu0 %v317_v6  ;;  %v708_v6 = vld [vmem:[%s1608_s11 + $0x10] sm:$0xff] }
 0x1ac   :  { %1182 = vmatprep.subr.mxu0 %v316_v7 }
 0x1ad   :  { %1183 = vmatpush3.msra.mxu0 %v316_v7  ;;  %v709_v7 = vld [vmem:[%s1608_s11 + $0x18] sm:$0xff] }
 0x1ae   :  { %1184 = vmatprep.subr.mxu0 %v315_v8 }
 0x1af   :  { %1185 = vmatpush3.msra.mxu0 %v315_v8  ;;  %v835_v8 = vld [vmem:[%s1610_s13] sm:$0xff] }
 0x1b0   :  { %1187 = vmatmul.mubr.msk.f32.vlgmr.msra.gmra.mxu0 %vm217_vm1, %v320_v9  ;;  %v732_v9 = vpop.permute.xlu0 %731 }
 0x1b1   :  { %1189 = vmatprep.mubr.msk.f32.mxu0 %vm217_vm1, %v321_v10 }
 0x1b4   :  { %1190 = vmatmul.mubr.msk.f32.gmra.mxu0 %vm217_vm1, %v322_v11  ;;  %v727_v11 = vpop.permute.xlu1 %726 }
 0x1b5   :  { %1214 = vmatprep.mubr.msk.f32.mxu0 %vm217_vm1, %v577_v32 }
 0x270   :  { %v1188_v14 = vpop.f32.mrf.mxu0 }
 0x271   :  { %v431_v21 = vadd.f32 %v1188_v14, %v335_v19 }
 0x272   :  { %v425_v16 = vpop.f32.mrf.mxu0 }
 0x273   :  { %v426_v25 = vadd.f32 %v425_v16, %v330_v24  ;;  %v445_v27 = vmax.f32 %v431_v21, 0.0 }
 0x274   :  { %v1191_v17 = vpop.f32.mrf.mxu0 }
 0x275   :  { %v441_v18 = vadd.f32 %v1191_v17, %v345_v13  ;;  %v444_v28 = vmax.f32 %v426_v25, 0.0  ;;  %v836_v25 = vld [vmem:[%s1610_s13 + $0x8] sm:$0xff] }
 0x276   :  { %v435_v20 = vpop.f32.mrf.mxu0 }
 0x277   :  { %v447_v22 = vmax.f32 %v441_v18, 0.0  ;;  %v436_v23 = vadd.f32 %v435_v20, %v340_v15  ;;  %v722_v15 = vpop.permute.xlu0 %721  ;;  %v717_v20 = vpop.permute.xlu1 %716 }
 0x279   :  { %v446_v26 = vmax.f32 %v436_v23, 0.0  ;;  %1192 = vmatprep.subr.mxu1 %v447_v22 }
 0x27a   :  { %1193 = vmatpush3.msra.mxu1 %v447_v22 }
 0x27b   :  { %1194 = vmatprep.subr.mxu1 %v446_v26 }
 0x27c   :  { %1195 = vmatpush3.msra.mxu1 %v446_v26  ;;  %v837_v26 = vld [vmem:[%s1610_s13 + $0x10] sm:$0xff] }
 0x27d   :  { %1196 = vmatprep.subr.mxu1 %v445_v27 }
 0x27e   :  { %1197 = vmatpush3.msra.mxu1 %v445_v27  ;;  %v838_v27 = vld [vmem:[%s1610_s13 + $0x18] sm:$0xff] }
 0x27f   :  { %1198 = vmatprep.subr.mxu1 %v444_v28 }
 0x280   :  { %1199 = vmatpush3.msra.mxu1 %v444_v28  ;;  %v1292_v28 = vmov 0.0  }
 0x281   :  { %1201 = vmatmul.mubr.msk.f32.vlgmr.msra.gmra.mxu1 %vm217_vm1, %v449_v29  ;;  %v861_v29 = vpop.permute.xlu0 %860 }
 0x282   :  { %1203 = vmatprep.mubr.msk.f32.mxu1 %vm217_vm1, %v450_v30 }
 0x285   :  { %1204 = vmatmul.mubr.msk.f32.gmra.mxu1 %vm217_vm1, %v451_v31  ;;  %v856_v31 = vpop.permute.xlu1 %855 }
 0x286   :  { %1228 = vmatprep.mubr.msk.f32.mxu1 %vm217_vm1, %v706_v52 }
 0x341   :  { %v1202_v34 = vpop.f32.mrf.mxu1 }
 0x342   :  { %v560_v41 = vadd.f32 %v1202_v34, %v464_v39 }
 0x343   :  { %v554_v36 = vpop.f32.mrf.mxu1 }
 0x344   :  { %v555_v45 = vadd.f32 %v554_v36, %v459_v44  ;;  %v574_v47 = vmax.f32 %v560_v41, 0.0 }
 0x345   :  { %v1205_v37 = vpop.f32.mrf.mxu1 }
 0x346   :  { %v570_v38 = vadd.f32 %v1205_v37, %v474_v33  ;;  %v573_v48 = vmax.f32 %v555_v45, 0.0  ;;  %v964_v45 = vld [vmem:[%s1612_s15] sm:$0xf] }
 0x347   :  { %v564_v40 = vpop.f32.mrf.mxu1 }
 0x348   :  { %v576_v42 = vmax.f32 %v570_v38, 0.0  ;;  %v565_v43 = vadd.f32 %v564_v40, %v469_v35  ;;  %v851_v35 = vpop.permute.xlu0 %850  ;;  %v846_v40 = vpop.permute.xlu1 %845 }
 0x34a   :  { %v575_v46 = vmax.f32 %v565_v43, 0.0  ;;  %1206 = vmatprep.subr.mxu0 %v576_v42 }
 0x34b   :  { %1207 = vmatpush3.msra.mxu0 %v576_v42 }
 0x34c   :  { %1208 = vmatprep.subr.mxu0 %v575_v46 }
 0x34d   :  { %1209 = vmatpush3.msra.mxu0 %v575_v46  ;;  %v969_v46 = vpop.permute.xlu0 %968 }
 0x34e   :  { %1210 = vmatprep.subr.mxu0 %v574_v47 }
 0x34f   :  { %1211 = vmatpush3.msra.mxu0 %v574_v47 }
 0x350   :  { %1212 = vmatprep.subr.mxu0 %v573_v48 }
 0x351   :  { %1213 = vmatpush3.msra.mxu0 %v573_v48 }
 0x352   :  { %1215 = vmatmul.mubr.msk.f32.vlgmr.msra.gmra.mxu0 %vm217_vm1, %v578_v49 }
 0x353   :  { %1217 = vmatprep.mubr.msk.f32.mxu0 %vm217_vm1, %v579_v50 }
 0x356   :  { %1218 = vmatmul.mubr.msk.f32.gmra.mxu0 %vm217_vm1, %v580_v51 }
 0x357   :  { %1242 = vmatprep.mubr.msk.f32.mxu0 %vm217_vm1, %v835_v8 }
 0x412   :  { %v1216_v54 = vpop.f32.mrf.mxu0 }
 0x413   :  { %v689_v61 = vadd.f32 %v1216_v54, %v593_v59 }
 0x414   :  { %v683_v56 = vpop.f32.mrf.mxu0 }
 0x415   :  { %v684_v1 = vadd.f32 %v683_v56, %v588_v0  ;;  %v703_v3 = vmax.f32 %v689_v61, 0.0 }
 0x416   :  { %v1219_v57 = vpop.f32.mrf.mxu0 }
 0x417   :  { %v699_v58 = vadd.f32 %v1219_v57, %v603_v53  ;;  %v702_v4 = vmax.f32 %v684_v1, 0.0 }
 0x418   :  { %v693_v60 = vpop.f32.mrf.mxu0 }
 0x419   :  { %v705_v62 = vmax.f32 %v699_v58, 0.0  ;;  %v694_v63 = vadd.f32 %v693_v60, %v598_v55 }
 0x41b   :  { %v704_v2 = vmax.f32 %v694_v63, 0.0  ;;  %1220 = vmatprep.subr.mxu1 %v705_v62 }
 0x41c   :  { %1221 = vmatpush3.msra.mxu1 %v705_v62 }
 0x41d   :  { %1222 = vmatprep.subr.mxu1 %v704_v2 }
 0x41e   :  { %1223 = vmatpush3.msra.mxu1 %v704_v2 }
 0x41f   :  { %1224 = vmatprep.subr.mxu1 %v703_v3 }
 0x420   :  { %1225 = vmatpush3.msra.mxu1 %v703_v3 }
 0x421   :  { %1226 = vmatprep.subr.mxu1 %v702_v4 }
 0x422   :  { %1227 = vmatpush3.msra.mxu1 %v702_v4 }
 0x423   :  { %1229 = vmatmul.mubr.msk.f32.vlgmr.msra.gmra.mxu1 %vm217_vm1, %v707_v5  ;;  %1248 = vmatprep.subr.mxu1 %v1292_v28 }
 0x424   :  { %1231 = vmatprep.mubr.msk.f32.mxu1 %vm217_vm1, %v708_v6 }
 0x427   :  { %1232 = vmatmul.mubr.msk.f32.gmra.mxu1 %vm217_vm1, %v709_v7 }
 0x428   :  { %1256 = vmatprep.mubr.msk.f32.mxu1 %vm1293_vm2, %v1292_v28 }
 0x4e3   :  { %v1230_v10 = vpop.f32.mrf.mxu1 }
 0x4e4   :  { %v818_v17 = vadd.f32 %v1230_v10, %v722_v15 }
 0x4e5   :  { %v812_v12 = vpop.f32.mrf.mxu1 }
 0x4e6   :  { %v813_v21 = vadd.f32 %v812_v12, %v717_v20  ;;  %v832_v23 = vmax.f32 %v818_v17, 0.0 }
 0x4e7   :  { %v1233_v13 = vpop.f32.mrf.mxu1 }
 0x4e8   :  { %v828_v14 = vadd.f32 %v1233_v13, %v732_v9  ;;  %v831_v24 = vmax.f32 %v813_v21, 0.0 }
 0x4e9   :  { %v822_v16 = vpop.f32.mrf.mxu1 }
 0x4ea   :  { %v834_v18 = vmax.f32 %v828_v14, 0.0  ;;  %v823_v19 = vadd.f32 %v822_v16, %v727_v11 }
 0x4ec   :  { %v833_v22 = vmax.f32 %v823_v19, 0.0  ;;  %1234 = vmatprep.subr.mxu0 %v834_v18 }
 0x4ed   :  { %1235 = vmatpush3.msra.mxu0 %v834_v18 }
 0x4ee   :  { %1236 = vmatprep.subr.mxu0 %v833_v22 }
 0x4ef   :  { %1237 = vmatpush3.msra.mxu0 %v833_v22 }
 0x4f0   :  { %1238 = vmatprep.subr.mxu0 %v832_v23 }
 0x4f1   :  { %1239 = vmatpush3.msra.mxu0 %v832_v23 }
 0x4f2   :  { %1240 = vmatprep.subr.mxu0 %v831_v24 }
 0x4f3   :  { %1241 = vmatpush3.msra.mxu0 %v831_v24 }
 0x4f4   :  { %1243 = vmatmul.mubr.msk.f32.vlgmr.msra.gmra.mxu0 %vm217_vm1, %v836_v25 }
 0x4f5   :  { %1245 = vmatprep.mubr.msk.f32.mxu0 %vm217_vm1, %v837_v26 }
 0x4f8   :  { %1246 = vmatmul.mubr.msk.f32.gmra.mxu0 %vm217_vm1, %v838_v27 }
 0x5b4   :  { %v1244_v30 = vpop.f32.mrf.mxu0 }
 0x5b5   :  { %v947_v37 = vadd.f32 %v1244_v30, %v851_v35 }
 0x5b6   :  { %v941_v32 = vpop.f32.mrf.mxu0 }
 0x5b7   :  { %v942_v41 = vadd.f32 %v941_v32, %v846_v40  ;;  %v961_v43 = vmax.f32 %v947_v37, 0.0 }
 0x5b8   :  { %v1247_v33 = vpop.f32.mrf.mxu0 }
 0x5b9   :  { %v957_v34 = vadd.f32 %v1247_v33, %v861_v29  ;;  %v960_v44 = vmax.f32 %v942_v41, 0.0 }
 0x5ba   :  { %v951_v36 = vpop.f32.mrf.mxu0 }
 0x5bb   :  { %v963_v38 = vmax.f32 %v957_v34, 0.0  ;;  %v952_v39 = vadd.f32 %v951_v36, %v856_v31 }
 0x5bd   :  { %v962_v42 = vmax.f32 %v952_v39, 0.0  ;;  %1249 = vmatpush3.msra.mxu1 %v963_v38 }
 0x5be   :  { %1250 = vmatprep.subr.mxu1 %v1292_v28 }
 0x5bf   :  { %1251 = vmatpush3.msra.mxu1 %v962_v42 }
 0x5c0   :  { %1252 = vmatprep.subr.mxu1 %v1292_v28 }
 0x5c1   :  { %1253 = vmatpush3.msra.mxu1 %v961_v43 }
 0x5c2   :  { %1254 = vmatprep.subr.mxu1 %v1292_v28 }
 0x5c3   :  { %1255 = vmatpush3.msra.mxu1 %v960_v44 }
 0x5c4   :  { %1257 = vmatmul.mubr.msk.f32.vlgmr.msra.gmra.mxu1 %vm217_vm1, %v964_v45 }
 0x684   :  { %v1040_v47 = vpop.f32.mrf.mxu1 }
 0x685   :  { %v1041_v48 = vadd.f32 %v1040_v47, %v969_v46 }
 0x686   :  { %v1258_v49 = vpop.f32.mrf.mxu1 }
 0x687   :  { %v1094_v50 = vmul.f32 -1.442695, %v1041_v48 }
 0x689   :  { %1265 = vpow2.f32 %v1094_v50 }
 0x696   :  { %v1266_v51 = vpop.eup %1265 }
 0x697   :  { %v1047_v52 = vadd.f32 1.0, %v1266_v51 }
 0x699   :  { %1267 = vrcp.f32 %v1047_v52 }
 0x6a6   :  { %v1268_v53 = vpop.eup %1267 }
 0x6a7   :  { %1050 = vst [vmem:[#allocation2] sm:$0xf] %v1268_v53 }
 0x6a8   :  { %1280 = shalt.err (!%p1277_p4)
}
 0x6a9   :  { %1060 = dma.vmem_to_hbm [thread:$0]  %s1058_s24, 64, %s1614_s17, [#allocation3]  }
 0x6aa   :  { %1289 = dma.done.wait [#allocation3], 64  }
 0x6ab   :  { %1290 = vsyncadd [#allocation3], 4294967232 }
 0x6ac   :  { %1064 = vsyncpa [#allocation3], 1 }

</bundles_post_ra>
